<compile_context>
chip_gen: v7x
topology: tpu7x:2x2x1
jax: 0.10.0
libtpu: 0.0.40
codegen_flags: <defaults>
</compile_context>

<pallas_src>
import functools
import math

import jax
import jax.numpy as jnp
from jax.experimental import pallas as pl
from jax.experimental.pallas import tpu as pltpu


def _round_up(x: int, m: int) -> int:
    return ((x + m - 1) // m) * m


def _make_positional_embedding(d_model: int, max_len: int) -> jnp.ndarray:
    """Same construction as the PyTorch PositionalEmbedding buffer."""
    assert d_model % 2 == 0, "sinusoidal PE requires an even d_model"
    position = jnp.arange(max_len, dtype=jnp.float32)[:, None]
    div_term = jnp.exp(
        jnp.arange(0, d_model, 2, dtype=jnp.float32) * (-math.log(10000.0) / d_model)
    )
    pe = jnp.zeros((max_len, d_model), dtype=jnp.float32)
    pe = pe.at[:, 0::2].set(jnp.sin(position * div_term))
    pe = pe.at[:, 1::2].set(jnp.cos(position * div_term))
    return pe


def _vmem_capacity_bytes() -> int:
    """Physical VMEM of the attached TPU; conservative fallback = 64 MiB (v7x)."""
    try:
        info = pltpu.get_tpu_info()
        return int(getattr(info, "vmem_capacity_bytes", 64 << 20))
    except Exception:
        return 64 << 20


# ---------------------------------------------------------------------------
# Path A: embedding table resident in VMEM, in-kernel dynamic row gather.
# ---------------------------------------------------------------------------
def _resident_kernel(ids_ref, emb_ref, pe_ref, out_ref, gather_buf,
                     *, seq_tile: int, scale: float):
    b = pl.program_id(0)
    si = pl.program_id(1)
    base = (b * pl.num_programs(1) + si) * seq_tile

    @pl.loop(0, seq_tile)
    def _(s):
        tok = ids_ref[base + s]                                   # SMEM scalar read
        gather_buf[pl.ds(s, 1), :] = emb_ref[pl.ds(tok, 1), :]    # VMEM row gather

    # One lane-dense (TS, Dp) slab: scale + positional add (dropout = identity).
    out_ref[0] = (gather_buf[...].astype(jnp.float32) * scale
                  + pe_ref[...].astype(jnp.float32))


# ---------------------------------------------------------------------------
# Path B: table stays in HBM; bounded-depth ring of row DMAs (huge tables).
# ---------------------------------------------------------------------------
def _hbm_gather_kernel(ids_ref, emb_hbm, pe_ref, out_ref,
                       row_ring, gather_buf, sems,
                       *, seq_tile: int, scale: float, ring: int):
    b = pl.program_id(0)
    si = pl.program_id(1)
    base = (b * pl.num_programs(1) + si) * seq_tile

    def start_row(s):
        tok = ids_ref[base + s]
        slot = s % ring
        pltpu.make_async_copy(emb_hbm.at[tok], row_ring.at[slot],
                              sems.at[slot]).start()

    # Prime the ring with the first `ring` rows.
    @pl.loop(0, ring)
    def _(s):
        start_row(s)

    # Consume row s, immediately refill its slot with row s + ring.
    @pl.loop(0, seq_tile)
    def _(s):
        slot = s % ring
        pltpu.make_async_copy(emb_hbm.at[0], row_ring.at[slot],
                              sems.at[slot]).wait()
        gather_buf[pl.ds(s, 1), :] = row_ring[pl.ds(slot, 1), :]

        @pl.when(s + ring < seq_tile)
        def _():
            start_row(s + ring)

    out_ref[0] = (gather_buf[...].astype(jnp.float32) * scale
                  + pe_ref[...].astype(jnp.float32))


# ---------------------------------------------------------------------------
# Wrapper
# ---------------------------------------------------------------------------
def input_embedding(tokens, emb_table, pos_embedding, *,
                    seq_tile=None, force_hbm_gather=False):
    """Pallas InputEmbedding forward (eval mode).

    tokens:        [B, S] integer token ids
    emb_table:     [V, D] embedding weights (f32 or bf16)
    pos_embedding: [max_len, D] sinusoidal table
    returns        [B, S, D] float32 = emb_table[tokens] * sqrt(D) + pe[:S]
    """
    B, S = tokens.shape
    V, D = emb_table.shape
    scale = float(math.sqrt(D))      # PyTorch uses sqrt(emb_size) (pre-padding)

    # Lane-dense last dim: pad D up to a multiple of 128.
    Dp = _round_up(D, 128)
    if Dp != D:
        emb_table = jnp.pad(emb_table, ((0, 0), (0, Dp - D)))
        pos_embedding = jnp.pad(pos_embedding, ((0, 0), (0, Dp - D)))

    # Sequence tile (multiple of 8); pad S up to a multiple of the tile.
    if seq_tile is None:
        seq_tile = min(_round_up(S, 8), 256)
    seq_tile = min(_round_up(seq_tile, 8), _round_up(S, 8))
    Sp = _round_up(S, seq_tile)

    # Clamp ids (no OOB gathers), pad, flatten to 1-D for compact SMEM layout.
    ids = jnp.clip(tokens.astype(jnp.int32), 0, V - 1)
    if Sp != S:
        ids = jnp.pad(ids, ((0, 0), (0, Sp - S)))
    ids = ids.reshape(B * Sp)

    # Positional slab covering the padded sequence.
    pe = pos_embedding[: min(Sp, pos_embedding.shape[0]), :]
    if pe.shape[0] < Sp:
        pe = jnp.pad(pe, ((0, Sp - pe.shape[0]), (0, 0)))

    grid = (B, Sp // seq_tile)
    itemsize = jnp.dtype(emb_table.dtype).itemsize
    tile_f32 = seq_tile * Dp * 4
    cap = _vmem_capacity_bytes()

    # Generation-aware residency decision (v7x: 64 MiB; v5e/v6e: 128 MiB).
    table_bytes = V * Dp * itemsize
    resident_need = (2 * table_bytes            # table (assume double-buffered)
                     + 2 * tile_f32             # PE blocks
                     + 2 * tile_f32             # output blocks
                     + seq_tile * Dp * itemsize)  # gather scratch
    use_resident = (not force_hbm_gather) and (resident_need <= int(cap * 0.75))

    pe_spec = pl.BlockSpec((seq_tile, Dp), lambda b, si, ids_sref: (si, 0))
    out_spec = pl.BlockSpec((1, seq_tile, Dp), lambda b, si, ids_sref: (b, si, 0))
    out_shape = jax.ShapeDtypeStruct((B, Sp, Dp), jnp.float32)

    if use_resident:
        kernel = functools.partial(_resident_kernel, seq_tile=seq_tile, scale=scale)
        in_specs = [
            pl.BlockSpec((V, Dp), lambda b, si, ids_sref: (0, 0)),  # table resident
            pe_spec,
        ]
        scratch_shapes = [pltpu.VMEM((seq_tile, Dp), emb_table.dtype)]
        vmem_need = resident_need
    else:
        ring = min(8, seq_tile)
        kernel = functools.partial(_hbm_gather_kernel, seq_tile=seq_tile,
                                   scale=scale, ring=ring)
        in_specs = [
            pl.BlockSpec(memory_space=pl.ANY),                      # table in HBM
            pe_spec,
        ]
        scratch_shapes = [
            pltpu.VMEM((ring, Dp), emb_table.dtype),                # DMA ring buffers
            pltpu.VMEM((seq_tile, Dp), emb_table.dtype),            # gathered tile
            pltpu.SemaphoreType.DMA((ring,)),
        ]
        vmem_need = 4 * tile_f32 + (ring + seq_tile) * Dp * itemsize

    vmem_limit = int(min(cap, max(vmem_need + (8 << 20), 32 << 20)))

    out = pl.pallas_call(
        kernel,
        out_shape=out_shape,
        grid_spec=pltpu.PrefetchScalarGridSpec(
            num_scalar_prefetch=1,            # flat token ids -> SMEM
            grid=grid,
            in_specs=in_specs,
            out_specs=out_spec,
            scratch_shapes=scratch_shapes,
        ),
        compiler_params=pltpu.CompilerParams(
            dimension_semantics=("parallel", "parallel"),   # tiles independent
            vmem_limit_bytes=vmem_limit,
        ),
    )(ids, emb_table, pe)

    return out[:, :S, :D]


def _reference(tokens, emb_table, pos_embedding):
    D = emb_table.shape[-1]
    S = tokens.shape[1]
    return emb_table[tokens] * math.sqrt(D) + pos_embedding[None, :S, :]


if __name__ == "__main__":
    key = jax.random.PRNGKey(0)
    k_tok, k_emb, k_tok2 = jax.random.split(key, 3)

    vocab_size, d_model, max_len = 512, 128, 512
    emb_table = jax.random.normal(k_emb, (vocab_size, d_model), dtype=jnp.float32)
    pos_embedding = _make_positional_embedding(d_model, max_len)

    # Primary (fast) path: table resident in VMEM, in-kernel gather.
    B, S = 2, 8
    tokens = jax.random.randint(k_tok, (B, S), 0, vocab_size, dtype=jnp.int32)
    out = input_embedding(tokens, emb_table, pos_embedding)
    jax.block_until_ready(out)
    ref = _reference(tokens, emb_table, pos_embedding)
    assert out.shape == (B, S, d_model)
    assert jnp.allclose(out, ref, atol=1e-5, rtol=1e-5), "resident-path mismatch"

    # Fallback path: table kept in HBM, bounded 8-deep DMA ring gather
    # (also exercises sequence padding / tiling / ring refill).
    B2, S2 = 2, 30
    tokens2 = jax.random.randint(k_tok2, (B2, S2), 0, vocab_size, dtype=jnp.int32)
    out2 = input_embedding(tokens2, emb_table, pos_embedding, force_hbm_gather=True)
    jax.block_until_ready(out2)
    ref2 = _reference(tokens2, emb_table, pos_embedding)
    assert out2.shape == (B2, S2, d_model)
    assert jnp.allclose(out2, ref2, atol=1e-5, rtol=1e-5), "hbm-path mismatch"

    print("KERNEL_OK")
</pallas_src>

<mosaic_0001>
module attributes {stable_mosaic.version = 11 : i64} {
  func.func @_resident_kernel(%arg0: i32, %arg1: i32, %arg2: memref<16xi32, #tpu.memory_space<smem>>, %arg3: memref<512x128xf32, #tpu.memory_space<vmem>>, %arg4: memref<8x128xf32, #tpu.memory_space<vmem>>, %arg5: memref<1x8x128xf32, #tpu.memory_space<vmem>>, %arg6: memref<8x128xf32, #tpu.memory_space<vmem>>) attributes {dimension_semantics = [#tpu.dimension_semantics<parallel>, #tpu.dimension_semantics<parallel>], iteration_bounds = array<i64: 2, 1>, scalar_prefetch = 1 : i64, scratch_operands = 1 : i64, tpu.core_type = #tpu.core_type<tc>, window_params = [{pipeline_mode = #tpu.pipeline_mode<synchronous>, transform_indices = @transform_0, window_bounds = array<i64: 512, 128>}, {transform_indices = @transform_1, window_bounds = array<i64: 8, 128>}, {transform_indices = @transform_2, window_bounds = array<i64: 1, 8, 128>}]} {
    %c1_i32 = arith.constant 1 : i32
    %0 = arith.muli %arg0, %c1_i32 : i32
    %1 = arith.addi %0, %arg1 : i32
    %c8_i32 = arith.constant 8 : i32
    %2 = arith.muli %1, %c8_i32 : i32
    %c0_i32 = arith.constant 0 : i32
    %c8_i32_0 = arith.constant 8 : i32
    %3 = arith.addi %c0_i32, %c8_i32_0 : i32
    %c1_i32_1 = arith.constant 1 : i32
    scf.for %arg7 = %c0_i32 to %3 step %c1_i32_1  : i32 {
      %c1_i32_9 = arith.constant 1 : i32
      %12 = arith.muli %arg7, %c1_i32_9 : i32
      %c0_i32_10 = arith.constant 0 : i32
      %13 = arith.addi %c0_i32_10, %12 : i32
      %14 = arith.addi %2, %13 : i32
      %15 = arith.index_cast %14 : i32 to index
      %16 = memref.load %arg2[%15] : memref<16xi32, #tpu.memory_space<smem>>
      %17 = arith.index_cast %16 : i32 to index
      %c0_11 = arith.constant 0 : index
      %18 = vector.load %arg3[%17, %c0_11] : memref<512x128xf32, #tpu.memory_space<vmem>>, vector<1x128xf32>
      %19 = arith.index_cast %13 : i32 to index
      %c0_12 = arith.constant 0 : index
      %20 = vector.load %arg6[%19, %c0_12] : memref<8x128xf32, #tpu.memory_space<vmem>>, vector<1x128xf32>
      tpu.vector_store %arg6[%19, %c0_12], %18 {strides = array<i32>} : memref<8x128xf32, #tpu.memory_space<vmem>>, vector<1x128xf32>,
    }
    %c8_i32_2 = arith.constant 8 : i32
    %c0 = arith.constant 0 : index
    %c0_3 = arith.constant 0 : index
    %4 = vector.load %arg6[%c0, %c0_3] : memref<8x128xf32, #tpu.memory_space<vmem>>, vector<8x128xf32>
    %cst = arith.constant 11.3137083 : f32
    %5 = vector.broadcast %cst : f32 to vector<8x128xf32>
    %6 = arith.mulf %4, %5 : vector<8x128xf32>
    %c0_4 = arith.constant 0 : index
    %c0_5 = arith.constant 0 : index
    %7 = vector.load %arg4[%c0_4, %c0_5] : memref<8x128xf32, #tpu.memory_space<vmem>>, vector<8x128xf32>
    %8 = arith.addf %6, %7 : vector<8x128xf32>
    %c0_6 = arith.constant 0 : index
    %c0_7 = arith.constant 0 : index
    %c0_8 = arith.constant 0 : index
    %9 = vector.load %arg5[%c0_6, %c0_7, %c0_8] : memref<1x8x128xf32, #tpu.memory_space<vmem>>, vector<1x8x128xf32>
    %10 = vector.shape_cast %9 : vector<1x8x128xf32> to vector<8x128xf32>
    %11 = vector.shape_cast %8 : vector<8x128xf32> to vector<1x8x128xf32>
    tpu.vector_store %arg5[%c0_6, %c0_7, %c0_8], %11 {strides = array<i32>} : memref<1x8x128xf32, #tpu.memory_space<vmem>>, vector<1x8x128xf32>,
    return
  }
  func.func @transform_0(%arg0: i32, %arg1: i32, %arg2: memref<16xi32, #tpu.memory_space<smem>>) -> (i32, i32) {
    %c0_i32 = arith.constant 0 : i32
    %c0_i32_0 = arith.constant 0 : i32
    %c0_i32_1 = arith.constant 0 : i32
    return %c0_i32, %c0_i32_0 : i32, i32
  }
  func.func @transform_1(%arg0: i32, %arg1: i32, %arg2: memref<16xi32, #tpu.memory_space<smem>>) -> (i32, i32) {
    %c0_i32 = arith.constant 0 : i32
    %c0_i32_0 = arith.constant 0 : i32
    return %arg1, %c0_i32 : i32, i32
  }
  func.func @transform_2(%arg0: i32, %arg1: i32, %arg2: memref<16xi32, #tpu.memory_space<smem>>) -> (i32, i32, i32) {
    %c0_i32 = arith.constant 0 : i32
    %c0_i32_0 = arith.constant 0 : i32
    return %arg0, %arg1, %c0_i32 : i32, i32, i32
  }
}

</mosaic_0001>

<bundles_post_ra>
// kernel: tpu_custom_call.1
= control target key start
LH: loop header
LB: loop body
LE: loop exit
PB: predicated region body
PF: predicated region fallthrough
CT: control target
= control target key end

     0   :  { %s783_s0 = inlined_call_operand.hbm [shape: s32[16], index: 0, kind: input, shape index: {}]   ;;  %s784_s1 = inlined_call_operand.hbm [shape: f32[512,128], index: 1, kind: input, shape index: {}]   ;;  %s785_s2 = inlined_call_operand.hbm [shape: f32[8,128], index: 2, kind: input, shape index: {}]   ;;  %s786_s3 = inlined_call_operand.hbm [shape: f32[2,8,128], index: 3, kind: output, shape index: {}]  }
   0x1   :  { %s398_s14 = scalar_lea.hbm %s783_s0, 16 }
   0x2   :  { %p399_p0 = scmp.ne.s32.totalorder %s783_s0, %s398_s14  ;;  %p402_p1 = scmp.lt.u32.totalorder %s398_s14, %s783_s0 }
   0x4   :  { %p404_p2 = pnand %p402_p1, %p399_p0 }
   0x6   :  { %407 = shalt.err (!%p404_p2)  }
   0x7   :  { %s562_s19 = smov [#allocation4]  }
   0x8   :  { %9 = dma.hbm_to_smem %s783_s0, 16, %s562_s19, [#allocation3] }
   0x9   :  { %520 = dma.done.wait [#allocation3], 16 }
   0xa   :  { %521 = vsyncadd [#allocation3], 4294967280 }
   0xb   :  { %11 = sfence }
   0xc   :  { %12 = vsyncpa [#allocation6], 0 }
   0xd   :  { %13 = vsyncpa [#allocation9], 0 }
   0xe   :  { %14 = vsyncpa [#allocation7], 0 }
   0xf   :  { %16 = vsyncpa [#allocation7 + $0x1], 0  ;;  %s600_s22 = smov 0   ;;  %s602_s23 = smov 0  }
  0x10   :  { %s604_s24 = smov 0   ;;  %s606_s25 = smov 0  }
  0x11   :  { %s608_s26 = smov 0   ;;  %s610_s27 = smov 0  }
  0x12 LB: > { %s297_s0 = sadd.s32 4294967295, %s556_s27   ;;  %s298_s28 = sadd.s32 4294967294, %s556_s27   ;;  %s556_s27 = sphi %s610_s27, %s22_s27   ;;  %s552_s26 = sphi %s608_s26, %s804_s26   ;;  %s548_s25 = sphi %s606_s25, %s803_s25   ;;  %s544_s24 = sphi %s604_s24, %s802_s24   ;;  %s540_s23 = sphi %s602_s23, %s801_s23   ;;  %s536_s22 = sphi %s600_s22, %s800_s22  }
  0x13   : > { %s34_s29 = sadd.s32 1, %s552_s26  ;;  %s90_s30 = sadd.s32 1, %s544_s24 }
  0x14   : > { %p36_p3 = scmp.ge.s32.totalorder %s34_s29, 2  ;;  %p100_p4 = scmp.ne.s32.totalorder %s544_s24, %s540_s23 }
  0x15   : > { %p101_p5 = scmp.eq.s32.totalorder %s297_s0, 1  ;;  %p106_p6 = scmp.ne.s32.totalorder %s540_s23, %s536_s22 }
  0x16   : > { %s806_s29 = smov (%p36_p3, %s34_s29), 0  ;;  %p107_p8 = scmp.eq.s32.totalorder %s298_s28, 1 }
  0x17   : > { %p640_p7 = por %p101_p5, %p100_p4  ;;  %s85_s5 = ssub.s32 %s552_s26, %s806_s29 }
  0x18   : > { %p299_p9 = scmp.ge.s32.totalorder %s556_s27, 1  ;;  %p88_p10 = scmp.eq.s32.totalorder %s85_s5, 0 }
  0x19   : > { %s791_s4 = scalar_select %p640_p7, 1, 0 }
  0x1a   : > { %p647_p11 = por %p107_p8, %p106_p6  ;;  %p114_p12 = scmp.lt.s32.totalorder %s556_s27, 3 }
  0x1b   : > { %s653_s7 = scalar_select %p88_p10, %s544_s24, %s90_s30  }
  0x1c   : > { %s792_s6 = scalar_select %p647_p11, 1, 0 }
  0x1d   : > { %p655_p13 = pnand %p299_p9, %p114_p12  ;;  %p659_p0 = scmp.eq.s32.totalorder %s297_s0, 0 }
  0x1e   : > { %s563_s10 = smov [#allocation5]   ;;  %s564_s13 = smov [#allocation8]  }
  0x1f   : > { %s793_s8 = scalar_select %p655_p13, 1, 0 }
  0x20   : > { %s794_s9 = scalar_select %p659_p0, 1, 0 }
  0x21   : > { %p321_p1 = pneg %p655_p13  ;;  %s126_s11 = sshll.u32 %s563_s10, 4  ;;  %s127_s11 = int_to_ptr.vmem [resolvable:$true] %s126_s11 }
  0x22   : > { %s142_s14 = sshll.u32 %s564_s13, 4  ;;  %s408_s17 = scalar_lea.hbm %s784_s1, 8192  ;;  %s671_s14 = int_to_ptr.vmem [resolvable:$true] %s142_s14 }
  0x23   : > { %p667_p2 = pnand %p659_p0, %p321_p1  ;;  %p409_p3 = scmp.ne.s32.totalorder %s784_s1, %s408_s17 }
  0x24   : > { %p415_p8 = scmp.lt.u32.totalorder %s408_s17, %s784_s1 }
  0x25   : > { %p410_p4 = pneg %p667_p2 }
  0x27   : > { %p411_p5 = pnand %p410_p4, %p409_p3 }
  0x29   : > { %p412_p6 = pneg %p411_p5 }
  0x2b   : > { %p417_p9 = pnand %p415_p8, %p412_p6 }
  0x2d   : > { %420 = shalt.err (!%p417_p9)
}
  0x2e   : > { %s421_s0 = scalar_lea.vmem %s127_s11, 8192  ;;  %p429_p11 = scmp.lt.s32.totalorder %s127_s11, %s127_s11 }
  0x2f   : > { %p422_p10 = scmp.ne.s32.totalorder %s127_s11, %s421_s0  ;;  %p430_p7 = scmp.lt.s32.totalorder %s421_s0, %s421_s0 }
  0x31   : > { %p424_p12 = pnand %p422_p10, %p410_p4  ;;  %p431_p0 = por %p430_p7, %p429_p11 }
  0x33   : > { %p425_p1 = pneg %p424_p12 }
  0x35   : > { %p432_p13 = pnand %p431_p0, %p425_p1 }
  0x37   : > { %435 = shalt.err (!%p432_p13)
}
  0x38   : > { %s565_s28 = smov 128   ;;  %s566_s30 = smov 8  }
  0x39   : > { %324 = dma.hbm_to_vmem [thread:$0]  (!%p667_p2), %s784_s1, 8192, %s127_s11, [#allocation6], %s565_s28, %s565_s28, %s566_s30  }
  0x3a   : > { %s436_s16 = scalar_lea.hbm %s785_s2, 128 }
  0x3b   : > { %p437_p3 = scmp.ne.s32.totalorder %s785_s2, %s436_s16  ;;  %p443_p13 = scmp.lt.u32.totalorder %s436_s16, %s785_s2 }
  0x3d   : > { %p439_p7 = pnand %p437_p3, %p410_p4 }
  0x3f   : > { %p440_p11 = pneg %p439_p7 }
  0x41   : > { %p445_p0 = pnand %p443_p13, %p440_p11 }
  0x43   : > { %448 = shalt.err (!%p445_p0)
}
  0x44   : > { %s449_s11 = scalar_lea.vmem %s671_s14, 128  ;;  %p457_p9 = scmp.lt.s32.totalorder %s671_s14, %s671_s14 }
  0x45   : > { %p450_p5 = scmp.ne.s32.totalorder %s671_s14, %s449_s11  ;;  %p458_p10 = scmp.lt.s32.totalorder %s449_s11, %s449_s11 }
  0x47   : > { %p452_p6 = pnand %p450_p5, %p410_p4  ;;  %p459_p12 = por %p458_p10, %p457_p9 }
  0x49   : > { %p453_p8 = pneg %p452_p6 }
  0x4b   : > { %p460_p1 = pnand %p459_p12, %p453_p8 }
  0x4d   : > { %463 = shalt.err (!%p460_p1)
}
  0x4e   : > { %327 = dma.hbm_to_vmem [thread:$0]  (!%p667_p2), %s785_s2, 128, %s671_s14, [#allocation9]  }
  0x4f   : > { %p796_p3 = scmp.ne.s32.totalorder %s793_s8, 0 }
  0x50   : > { %p797_p7 = scmp.ne.s32.totalorder (!%p796_p3), %s794_s9, 0 }
  0x51   : > { %155 = sbr.rel (%p796_p3) target bundleno = 129 (0x81), region = 28 }
  0x58   : > { %523 = dma.done.wait (%p797_p7), [#allocation6], 8192  }
  0x59   : > { %525 = vsyncadd (%p797_p7), [#allocation6], 4294959104 }
  0x5a   : > { %527 = dma.done.wait (%p797_p7), [#allocation9], 128  }
  0x5b   : > { %529 = vsyncadd (%p797_p7), [#allocation9], 4294967168  ;;  %s173_s12 = sand.u32 1, %s540_s23   ;;  %s306_s28 = sshll.u32 %s548_s25, 3 }
  0x5c   : > { %s305_s14 = sshll.u32 %s173_s12, 3  ;;  %s558_s8 = smov 0  }
  0x5d   : > { %s175_s30 = scalar_lea.vmem [#allocation10], %s305_s14 }
  0x5e LB: >> { %s184_s5 = sadd.s32 %s560_s8, %s306_s28  ;;  %s188_s15 = scalar_lea.vmem [#allocation2], %s560_s8  ;;  %s560_s8 = sphi %s558_s8, %s183_s8  }
  0x5f   : >> { %s185_s10 = sld [smem:[#allocation4 + %s184_s5]]  ;;  %s183_s8 = sadd.s32 1, %s560_s8  }
  0x60   : >> { %p180_p2 = scmp.ge.s32.totalorder %s183_s8, 8  }
  0x61   : > { %v192_v2 = vld [vmem:[#allocation8] sm:$0xff] (%p180_p2)  ;;  %s308_s9 = sshll.u32 (%p180_p2), %s548_s25, 7  ;;  %s210_s16 = sshll.u32 (%p180_p2), %s175_s30, 4  ;;  %s738_s16 = int_to_ptr.vmem [resolvable:$true] %s210_s16 }
  0x62   : > { %182 = sbr.rel (!%p180_p2) target bundleno = 94 (0x5e), region = 79  ;;  %s736_s19 = scalar_lea.hbm (%p180_p2), %s786_s3, %s308_s9 }
  0x63   : > { %s196_s20 = scalar_lea.sflag (%p180_p2), [#allocation7], %s173_s12  ;;  %s464_s11 = scalar_lea.vmem (%p180_p2), %s738_s16, 128 }
  0x64   : > { %p465_p4 = scmp.ne.s32.totalorder (%p180_p2), %s738_s16, %s464_s11  ;;  %p798_p11 = scmp.ne.s32.totalorder (%p180_p2), %s791_s4, 0 }
  0x65   : >> { %s186_s13 = scalar_lea.vmem [#allocation5], %s185_s10  ;;  %s567_s25 = smov (%p180_p2), [#allocation10]  }
  0x66   : >> { %v187_v0 = vld [vmem:[%s186_s13] sm:$0x1]  ;;  %p466_p13 = pnand (%p180_p2), %p465_p4, %p798_p11  ;;  %s468_s21 = sshll.u32 (%p180_p2), %s567_s25, 4  ;;  %s469_s21 = int_to_ptr.vmem [resolvable:$false] %s468_s21 }
  0x67   : >> { %189 = vst [vmem:[%s188_s15] sm:$0x1] %v187_v0  ;;  %s470_s0 = scalar_lea.vmem (%p180_p2), %s469_s21, 256  ;;  %p471_p5 = scmp.lt.s32.totalorder (%p180_p2), %s738_s16, %s469_s21 }
  0x68   : > { %p467_p0 = pneg (%p180_p2), %p466_p13  ;;  %p472_p6 = scmp.lt.s32.totalorder (%p180_p2), %s470_s0, %s464_s11 }
  0x6a   : > { %p473_p8 = por %p472_p6, %p471_p5 }
  0x6c   : > { %p474_p9 = pnand %p473_p8, %p467_p0 }
  0x6e   : > { %v190_v1 = vld [vmem:[#allocation2] sm:$0xff] }
  0x6f   : > { %v191_v3 = vmul.f32 11.313708, %v190_v1 }
  0x71   : > { %v193_v4 = vadd.f32 %v192_v2, %v191_v3 }
  0x73   : > { %194 = vst [vmem:[%s175_s30] sm:$0xff] %v193_v4 }
  0x74   : > { %477 = shalt.err (!%p474_p9)
}
  0x75   : > { %s478_s12 = scalar_lea.hbm %s736_s19, 128  ;;  %s482_s30 = scalar_lea.hbm %s786_s3, 256 }
  0x76   : > { %p479_p10 = scmp.ne.s32.totalorder %s736_s19, %s478_s12  ;;  %p483_p3 = scmp.lt.u32.totalorder %s736_s19, %s786_s3 }
  0x77   : > { %p484_p7 = scmp.lt.u32.totalorder %s482_s30, %s478_s12  ;;  %p486_p4 = scmp.lt.u32.totalorder %s478_s12, %s736_s19 }
  0x78   : > { %p480_p12 = pnand %p479_p10, %p798_p11 }
  0x79   : > { %p485_p2 = por %p484_p7, %p483_p3 }
  0x7a   : > { %p481_p1 = pneg %p480_p12 }
  0x7b   : > { %p487_p13 = por %p486_p4, %p485_p2 }
  0x7d   : > { %p488_p0 = pnand %p487_p13, %p481_p1 }
  0x7f   : > { %491 = shalt.err (!%p488_p0)
}
  0x80   : > { %319 = dma.vmem_to_hbm [thread:$0]  (%p798_p11), %s738_s16, 128, %s736_s19, %s196_s20  }
  0x81 PF: > { %p336_p5 = scmp.ge.s32.totalorder %s556_s27, 2  ;;  %s222_s10 = sand.u32 1, %s536_s22  }
  0x82   : > { %p799_p6 = scmp.ne.s32.totalorder %s792_s6, 0  ;;  %s223_s13 = scalar_lea.sflag [#allocation7], %s222_s10 }
  0x84   : > { %p329_p8 = pnand %p336_p5, %p799_p6 }
  0x86   : > { %531 = dma.done.wait (!%p329_p8), %s223_s13, 128  }
  0x87   : > { %533 = vsyncadd (!%p329_p8), %s223_s13, 4294967168  ;;  %s22_s27 = sadd.s32 1, %s556_s27   ;;  %s800_s22 = smov %s540_s23 }
  0x88   : > { %p19_p9 = scmp.ge.s32.totalorder %s22_s27, 4   ;;  %s801_s23 = smov %s544_s24 }
  0x89   : > { %s802_s24 = smov %s653_s7  ;;  %s803_s25 = smov %s552_s26 }
  0x8a   : > { %s804_s26 = smov %s806_s29  ;;  %21 = sbr.rel (!%p19_p9) target bundleno = 18 (0x12), region = 90 }
  0x91   :  { %228 = vsyncpa [#allocation6], 1 }
  0x92   :  { %230 = vsyncpa [#allocation6 + $0x1], 1 }
  0x93   :  { %231 = vsyncpa [#allocation9], 1 }
  0x94   :  { %232 = vsyncpa [#allocation7], 1 }
  0x95   :  { %234 = vsyncpa [#allocation7 + $0x1], 1 }

</bundles_post_ra>
